<compile_context>
chip_gen: v6e
topology: v6e:2x2x1
jax: 0.10.0
libtpu: 0.0.40
codegen_flags: <defaults>
</compile_context>

<pallas_src>
import math
import functools

import jax
import jax.numpy as jnp
from jax.experimental import pallas as pl
from jax.experimental.pallas import tpu as pltpu

F32 = jnp.float32
BF16 = jnp.bfloat16

VMEM_LIMIT = 32 * 1024 * 1024  # safe on v5e/v6e/v7x; above v5e's 16 MiB scoped default
NEG_INF = -1e30                # finite "masked" value (avoids exp(-inf - -inf) NaNs)


def _pick_tile(dim, preferred, align):
    """Largest tile <= preferred that is a multiple of `align` and divides `dim`;
    falls back to the full dimension (always legal: block dim == array dim)."""
    if dim <= preferred:
        return dim
    t = (preferred // align) * align
    while t >= align:
        if dim % t == 0:
            return t
        t -= align
    return dim


# ----------------------------------------------------------------------------
# Tiled matmul kernel with optional fused LayerNorm prologue and
# bias / QuickGELU / residual epilogue.
# ----------------------------------------------------------------------------

def _matmul_kernel(*refs, n_k, has_bias, has_res, has_ln, activation):
    it = iter(refs)
    x_ref = next(it)
    g_ref = next(it) if has_ln else None
    be_ref = next(it) if has_ln else None
    w_ref = next(it)
    b_ref = next(it) if has_bias else None
    r_ref = next(it) if has_res else None
    o_ref = next(it)
    acc_ref = next(it)

    k = pl.program_id(2)

    @pl.when(k == 0)
    def _():
        acc_ref[...] = jnp.zeros_like(acc_ref)

    x = x_ref[...].astype(jnp.float32)
    if has_ln:  # fused pre-LayerNorm (requires full K in this tile)
        mean = jnp.mean(x, axis=-1, keepdims=True)
        var = jnp.mean(jnp.square(x - mean), axis=-1, keepdims=True)
        x = (x - mean) * jax.lax.rsqrt(var + 1e-5)
        x = x * g_ref[...] + be_ref[...]

    acc_ref[...] += jnp.dot(x.astype(BF16), w_ref[...].astype(BF16),
                            preferred_element_type=jnp.float32)

    @pl.when(k == n_k - 1)
    def _():
        out = acc_ref[...]
        if has_bias:
            out = out + b_ref[...].astype(jnp.float32)
        if activation == "quick_gelu":
            out = out * jax.nn.sigmoid(1.702 * out)
        if has_res:
            out = out + r_ref[...].astype(jnp.float32)
        o_ref[...] = out.astype(o_ref.dtype)


def matmul(x, w, bias=None, residual=None, activation=None, ln=None,
           out_dtype=None, tm=256, tn=256, tk=512):
    """out = [residual +] act([LN(x)] @ w [+ bias]).

    x: (M, K) f32, w: (K, N) bf16/f32 (pre-transposed), bias: (N,), residual: (M, N),
    ln: optional (gamma, beta) fused LayerNorm over K (forces K untiled)."""
    M, K = x.shape
    K2, N = w.shape
    assert K == K2
    out_dtype = out_dtype or x.dtype

    tm = _pick_tile(M, tm, 8)
    tn = _pick_tile(N, tn, 128)
    tk = K if ln is not None else _pick_tile(K, tk, 128)
    n_k = K // tk
    grid = (M // tm, N // tn, n_k)

    in_specs = [pl.BlockSpec((tm, tk), lambda i, j, k: (i, k))]
    args = [x]
    if ln is not None:
        g, be = ln
        in_specs += [pl.BlockSpec((1, K), lambda i, j, k: (0, 0)),
                     pl.BlockSpec((1, K), lambda i, j, k: (0, 0))]
        args += [g.reshape(1, K).astype(F32), be.reshape(1, K).astype(F32)]
    in_specs.append(pl.BlockSpec((tk, tn), lambda i, j, k: (k, j)))
    args.append(w)
    if bias is not None:
        in_specs.append(pl.BlockSpec((1, tn), lambda i, j, k: (0, j)))
        args.append(bias.reshape(1, N).astype(F32))
    if residual is not None:
        in_specs.append(pl.BlockSpec((tm, tn), lambda i, j, k: (i, j)))
        args.append(residual)

    kernel = functools.partial(
        _matmul_kernel, n_k=n_k, has_bias=bias is not None,
        has_res=residual is not None, has_ln=ln is not None, activation=activation)

    return pl.pallas_call(
        kernel,
        out_shape=jax.ShapeDtypeStruct((M, N), out_dtype),
        grid=grid,
        in_specs=in_specs,
        out_specs=pl.BlockSpec((tm, tn), lambda i, j, k: (i, j)),
        scratch_shapes=[pltpu.VMEM((tm, tn), jnp.float32)],
        compiler_params=pltpu.CompilerParams(
            dimension_semantics=("parallel", "parallel", "arbitrary"),
            vmem_limit_bytes=VMEM_LIMIT),
    )(*args)


# ----------------------------------------------------------------------------
# Standalone LayerNorm (only used for ln_pre, whose output is the residual stream)
# ----------------------------------------------------------------------------

def _layernorm_kernel(x_ref, g_ref, b_ref, o_ref):
    x = x_ref[...].astype(jnp.float32)
    mean = jnp.mean(x, axis=-1, keepdims=True)
    var = jnp.mean(jnp.square(x - mean), axis=-1, keepdims=True)
    y = (x - mean) * jax.lax.rsqrt(var + 1e-5)
    o_ref[...] = (y * g_ref[...] + b_ref[...]).astype(o_ref.dtype)


def layernorm(x, g, b, tm=256):
    M, D = x.shape
    tm = _pick_tile(M, tm, 8)
    return pl.pallas_call(
        _layernorm_kernel,
        out_shape=jax.ShapeDtypeStruct((M, D), x.dtype),
        grid=(M // tm,),
        in_specs=[pl.BlockSpec((tm, D), lambda i: (i, 0)),
                  pl.BlockSpec((1, D), lambda i: (0, 0)),
                  pl.BlockSpec((1, D), lambda i: (0, 0))],
        out_specs=pl.BlockSpec((tm, D), lambda i: (i, 0)),
        compiler_params=pltpu.CompilerParams(
            dimension_semantics=("parallel",),
            vmem_limit_bytes=VMEM_LIMIT),
    )(x, g.reshape(1, D).astype(F32), b.reshape(1, D).astype(F32))


# ----------------------------------------------------------------------------
# Flash attention (online softmax over kv tiles); causal mask generated in-kernel
# ----------------------------------------------------------------------------

def _flash_attn_kernel(q_ref, k_ref, v_ref, o_ref, m_sc, l_sc, acc_sc,
                       *, scale, causal, n_kv, kv_tile):
    kv = pl.program_id(1)

    @pl.when(kv == 0)
    def _():
        m_sc[...] = jnp.full_like(m_sc, NEG_INF)
        l_sc[...] = jnp.zeros_like(l_sc)
        acc_sc[...] = jnp.zeros_like(acc_sc)

    q = q_ref[0, :, :].astype(BF16)          # (L, Dh)
    k = k_ref[0, :, :].astype(BF16)          # (tk, Dh)
    v = v_ref[0, :, :].astype(BF16)          # (tk, Dh)

    # s = q @ k^T  (contract on Dh; no explicit transpose)
    s = jax.lax.dot_general(q, k, (((1,), (1,)), ((), ())),
                            preferred_element_type=jnp.float32) * scale
    if causal:
        q_idx = jax.lax.broadcasted_iota(jnp.int32, s.shape, 0)
        k_idx = jax.lax.broadcasted_iota(jnp.int32, s.shape, 1) + kv * kv_tile
        s = jnp.where(k_idx > q_idx, NEG_INF, s)

    m_prev = m_sc[...]
    m_new = jnp.maximum(m_prev, jnp.max(s, axis=-1, keepdims=True))
    alpha = jnp.exp(m_prev - m_new)
    p = jnp.exp(s - m_new)
    l_sc[...] = alpha * l_sc[...] + jnp.sum(p, axis=-1, keepdims=True)
    acc_sc[...] = alpha * acc_sc[...] + jnp.dot(p.astype(BF16), v,
                                                preferred_element_type=jnp.float32)
    m_sc[...] = m_new

    @pl.when(kv == n_kv - 1)
    def _():
        inv_l = pl.reciprocal(l_sc[...], approx=True)     # EUP, off the VALU
        o_ref[0, :, :] = (acc_sc[...] * inv_l).astype(o_ref.dtype)


def flash_attention(q, k, v, *, scale, causal):
    """q/k/v: (B*H, L, Dh) f32 -> (B*H, L, Dh)."""
    BH, L, Dh = q.shape
    kv_tile = _pick_tile(L, 512, 8)
    n_kv = L // kv_tile
    kernel = functools.partial(_flash_attn_kernel, scale=scale, causal=causal,
                               n_kv=n_kv, kv_tile=kv_tile)
    return pl.pallas_call(
        kernel,
        out_shape=jax.ShapeDtypeStruct((BH, L, Dh), q.dtype),
        grid=(BH, n_kv),
        in_specs=[
            pl.BlockSpec((1, L, Dh), lambda b, kv: (b, 0, 0)),
            pl.BlockSpec((1, kv_tile, Dh), lambda b, kv: (b, kv, 0)),
            pl.BlockSpec((1, kv_tile, Dh), lambda b, kv: (b, kv, 0)),
        ],
        out_specs=pl.BlockSpec((1, L, Dh), lambda b, kv: (b, 0, 0)),
        scratch_shapes=[
            pltpu.VMEM((L, 1), jnp.float32),
            pltpu.VMEM((L, 1), jnp.float32),
            pltpu.VMEM((L, Dh), jnp.float32),
        ],
        compiler_params=pltpu.CompilerParams(
            dimension_semantics=("parallel", "arbitrary"),
            vmem_limit_bytes=VMEM_LIMIT),
    )(q, k, v)


# ----------------------------------------------------------------------------
# CLIP logit head: L2-normalize (rsqrt + eps), scale, one MXU matmul.
# ----------------------------------------------------------------------------

def _clip_logits_kernel(img_ref, txt_ref, s_ref, o_ref):
    img = img_ref[...].astype(jnp.float32)
    txt = txt_ref[...].astype(jnp.float32)
    img = img * jax.lax.rsqrt(jnp.sum(img * img, axis=-1, keepdims=True) + 1e-12)
    txt = txt * jax.lax.rsqrt(jnp.sum(txt * txt, axis=-1, keepdims=True) + 1e-12)
    scale = jnp.exp(s_ref[0, 0])
    logits = jax.lax.dot_general(img, txt, (((1,), (1,)), ((), ())),
                                 preferred_element_type=jnp.float32)
    o_ref[...] = (scale * logits).astype(o_ref.dtype)


def clip_logits(img_feat, txt_feat, logit_scale):
    Bi, E = img_feat.shape
    Bt = txt_feat.shape[0]
    scale = logit_scale.reshape(1, 1).astype(F32)
    logits_per_image = pl.pallas_call(
        _clip_logits_kernel,
        out_shape=jax.ShapeDtypeStruct((Bi, Bt), F32),
        grid=(1,),
        in_specs=[pl.BlockSpec((Bi, E), lambda i: (0, 0)),
                  pl.BlockSpec((Bt, E), lambda i: (0, 0)),
                  pl.BlockSpec((1, 1), lambda i: (0, 0))],
        out_specs=pl.BlockSpec((Bi, Bt), lambda i: (0, 0)),
        compiler_params=pltpu.CompilerParams(vmem_limit_bytes=VMEM_LIMIT),
    )(img_feat, txt_feat, scale)
    logits_per_text = logits_per_image.T          # cheap wrapper transpose, exact
    return logits_per_image, logits_per_text


# ----------------------------------------------------------------------------
# Model glue (batch-major (N, L, E) layout — no (L, N, E) permutes)
# ----------------------------------------------------------------------------

def residual_attn_block(x, p, n_head, causal):
    """x: (N, L, E). Pre-LN attention + pre-LN MLP with fused LN / bias / residual."""
    N, L, E = x.shape
    Dh = E // n_head
    scale = 1.0 / math.sqrt(Dh)
    x2 = x.reshape(N * L, E)

    # ln_1 fused into the qkv projection
    qkv = matmul(x2, p['in_proj_w'], bias=p['in_proj_b'],
                 ln=(p['ln1_g'], p['ln1_b']))                       # (N*L, 3E)
    # single combined head-split transpose for q, k and v
    qkv = qkv.reshape(N, L, 3, n_head, Dh).transpose(2, 0, 3, 1, 4)  # (3, N, H, L, Dh)
    q = qkv[0].reshape(N * n_head, L, Dh)
    k = qkv[1].reshape(N * n_head, L, Dh)
    v = qkv[2].reshape(N * n_head, L, Dh)

    o = flash_attention(q, k, v, scale=scale, causal=causal)        # (N*H, L, Dh)
    o = o.reshape(N, n_head, L, Dh).transpose(0, 2, 1, 3).reshape(N * L, E)

    # out-projection with residual fused in the epilogue
    x2 = matmul(o, p['out_proj_w'], bias=p['out_proj_b'], residual=x2)

    # ln_2 fused into c_fc; QuickGELU in the epilogue
    h = matmul(x2, p['c_fc_w'], bias=p['c_fc_b'], activation='quick_gelu',
               ln=(p['ln2_g'], p['ln2_b']))                          # (N*L, 4E)
    # c_proj with residual fused
    x2 = matmul(h, p['c_proj_w'], bias=p['c_proj_b'], residual=x2)
    return x2.reshape(N, L, E)


def vision_transformer_forward(image, vp, cfg):
    """image: (N, 3, H, W) NCHW f32 -> (N, embed_dim)."""
    N, C, H, W = image.shape
    ps = cfg['vision_patch_size']
    width = cfg['vision_width']
    gh, gw = H // ps, W // ps

    # conv1 (kernel == stride == patch) == im2col + bias-free tiled matmul
    patches = image.reshape(N, C, gh, ps, gw, ps).transpose(0, 2, 4, 1, 3, 5)
    patches = patches.reshape(N * gh * gw, C * ps * ps)
    x = matmul(patches, vp['conv1_w'])                               # (N*P, width)
    x = x.reshape(N, gh * gw, width)

    cls = jnp.broadcast_to(vp['class_embedding'][None, None, :], (N, 1, width))
    x = jnp.concatenate([cls, x], axis=1)                            # (N, L, width)
    x = x + vp['pos_embedding'][None]
    L = x.shape[1]

    # ln_pre output is the residual stream -> standalone LN kernel
    x = layernorm(x.reshape(N * L, width), vp['ln_pre_g'], vp['ln_pre_b'])
    x = x.reshape(N, L, width)

    for blk in vp['blocks']:
        x = residual_attn_block(x, blk, cfg['vision_heads'], causal=False)

    cls_out = x[:, 0, :]                                             # (N, width)
    # ln_post fused into the image projection (bias-free)
    feat = matmul(cls_out, vp['proj'], ln=(vp['ln_post_g'], vp['ln_post_b']))
    return feat


def encode_text(text, tp, cfg):
    """text: (B, ctx) int32 -> (B, embed_dim)."""
    B, L = text.shape
    width = cfg['transformer_width']

    x = tp['token_embedding'][text]                                  # gather (glue)
    x = x + tp['positional_embedding'][None]                         # (B, L, width)

    for blk in tp['blocks']:
        x = residual_attn_block(x, blk, cfg['transformer_heads'], causal=True)

    eot = jnp.argmax(text, axis=-1)
    pooled = x[jnp.arange(B), eot]                                   # (B, width)
    # ln_final (per-row) fused into the text projection (bias-free)
    feat = matmul(pooled, tp['text_projection'], ln=(tp['ln_final_g'], tp['ln_final_b']))
    return feat


def clip_forward(image, text, params, cfg):
    img_feat = vision_transformer_forward(image.astype(F32), params['visual'], cfg)
    txt_feat = encode_text(text, params['text'], cfg)
    return clip_logits(img_feat, txt_feat, params['logit_scale'])


# ----------------------------------------------------------------------------
# Deterministic parameter initialization (weights pre-transposed to (K, N), bf16)
# ----------------------------------------------------------------------------

def _init_block(key, width, n_layers):
    k = jax.random.split(key, 4)
    attn_std = width ** -0.5
    proj_std = (width ** -0.5) * ((2 * n_layers) ** -0.5)
    fc_std = (2 * width) ** -0.5
    return dict(
        ln1_g=jnp.ones((width,), F32), ln1_b=jnp.zeros((width,), F32),
        in_proj_w=(attn_std * jax.random.normal(k[0], (width, 3 * width))).astype(BF16),
        in_proj_b=jnp.zeros((3 * width,), F32),
        out_proj_w=(proj_std * jax.random.normal(k[1], (width, width))).astype(BF16),
        out_proj_b=jnp.zeros((width,), F32),
        ln2_g=jnp.ones((width,), F32), ln2_b=jnp.zeros((width,), F32),
        c_fc_w=(fc_std * jax.random.normal(k[2], (width, 4 * width))).astype(BF16),
        c_fc_b=jnp.zeros((4 * width,), F32),
        c_proj_w=(proj_std * jax.random.normal(k[3], (4 * width, width))).astype(BF16),
        c_proj_b=jnp.zeros((width,), F32),
    )


def init_clip_params(key, cfg):
    keys = jax.random.split(key, 4)
    vw = cfg['vision_width']
    tw = cfg['transformer_width']
    ps = cfg['vision_patch_size']
    n_patches = (cfg['image_resolution'] // ps) ** 2
    vscale = vw ** -0.5

    vkeys = jax.random.split(keys[0], 4 + cfg['vision_layers'])
    conv1 = 0.02 * jax.random.normal(vkeys[0], (vw, 3, ps, ps))
    visual = dict(
        # conv weight flattened + transposed once here -> (C*p*p, width), bf16
        conv1_w=conv1.reshape(vw, -1).T.astype(BF16),
        class_embedding=(vscale * jax.random.normal(vkeys[1], (vw,))).astype(F32),
        pos_embedding=(vscale * jax.random.normal(vkeys[2], (n_patches + 1, vw))).astype(F32),
        proj=(vscale * jax.random.normal(vkeys[3], (vw, cfg['embed_dim']))).astype(BF16),
        ln_pre_g=jnp.ones((vw,), F32), ln_pre_b=jnp.zeros((vw,), F32),
        ln_post_g=jnp.ones((vw,), F32), ln_post_b=jnp.zeros((vw,), F32),
        blocks=[_init_block(vkeys[4 + i], vw, cfg['vision_layers'])
                for i in range(cfg['vision_layers'])],
    )

    tkeys = jax.random.split(keys[1], 3 + cfg['transformer_layers'])
    text = dict(
        token_embedding=(0.02 * jax.random.normal(tkeys[0], (cfg['vocab_size'], tw))).astype(F32),
        positional_embedding=(0.01 * jax.random.normal(tkeys[1], (cfg['context_length'], tw))).astype(F32),
        text_projection=((tw ** -0.5) * jax.random.normal(tkeys[2], (tw, cfg['embed_dim']))).astype(BF16),
        ln_final_g=jnp.ones((tw,), F32), ln_final_b=jnp.zeros((tw,), F32),
        blocks=[_init_block(tkeys[3 + i], tw, cfg['transformer_layers'])
                for i in range(cfg['transformer_layers'])],
    )

    return dict(
        visual=visual,
        text=text,
        logit_scale=jnp.asarray(math.log(1.0 / 0.07), dtype=F32),
    )


# ----------------------------------------------------------------------------
# Main
# ----------------------------------------------------------------------------

if __name__ == "__main__":
    # Small ViT-based CLIP config (int vision_layers -> VisionTransformer branch).
    cfg = dict(
        embed_dim=32,
        image_resolution=16,
        vision_layers=2,
        vision_width=64,
        vision_patch_size=4,
        context_length=8,
        vocab_size=64,
        transformer_width=32,
        transformer_heads=2,
        transformer_layers=2,
    )
    cfg['vision_heads'] = cfg['vision_width'] // 64   # == 1, as in the reference

    key = jax.random.PRNGKey(0)
    kp, kimg, ktxt = jax.random.split(key, 3)

    params = init_clip_params(kp, cfg)

    image = jax.random.normal(
        kimg, (2, 3, cfg['image_resolution'], cfg['image_resolution']), dtype=F32)   # NCHW
    text = jax.random.randint(
        ktxt, (2, cfg['context_length']), 0, cfg['vocab_size'], dtype=jnp.int32)

    logits_per_image, logits_per_text = clip_forward(image, text, params, cfg)
    jax.block_until_ready((logits_per_image, logits_per_text))

    assert logits_per_image.shape == (2, 2)
    assert logits_per_text.shape == (2, 2)
    assert bool(jnp.all(jnp.isfinite(logits_per_image)))
    assert bool(jnp.all(jnp.isfinite(logits_per_text)))

    print("KERNEL_OK")
</pallas_src>

<mosaic_0001>
module attributes {stable_mosaic.version = 11 : i64} {
  func.func @_matmul_kernel(%arg0: i32, %arg1: i32, %arg2: i32, %arg3: memref<32x48xf32, #tpu.memory_space<vmem>>, %arg4: memref<48x64xbf16, #tpu.memory_space<vmem>>, %arg5: memref<32x64xf32, #tpu.memory_space<vmem>>, %arg6: memref<32x64xf32, #tpu.memory_space<vmem>>) attributes {dimension_semantics = [#tpu.dimension_semantics<parallel>, #tpu.dimension_semantics<parallel>, #tpu.dimension_semantics<arbitrary>], iteration_bounds = array<i64: 1, 1, 1>, scalar_prefetch = 0 : i64, scratch_operands = 1 : i64, tpu.core_type = #tpu.core_type<tc>, window_params = [{transform_indices = @transform_0, window_bounds = array<i64: 32, 48>}, {transform_indices = @transform_1, window_bounds = array<i64: 48, 64>}, {transform_indices = @transform_2, window_bounds = array<i64: 32, 64>}]} {
    %c0_i32 = arith.constant 0 : i32
    %0 = arith.cmpi eq, %arg2, %c0_i32 : i32
    %1 = arith.extui %0 : i1 to i32
    %c0_i32_0 = arith.constant 0 : i32
    %2 = arith.cmpi ne, %1, %c0_i32_0 : i32
    scf.if %2 {
      %cst_10 = arith.constant 0.000000e+00 : f32
      %13 = vector.broadcast %cst_10 : f32 to vector<32x64xf32>
      %c0_11 = arith.constant 0 : index
      %c0_12 = arith.constant 0 : index
      %14 = vector.load %arg6[%c0_11, %c0_12] : memref<32x64xf32, #tpu.memory_space<vmem>>, vector<32x64xf32>
      tpu.vector_store %arg6[%c0_11, %c0_12], %13 {strides = array<i32>} : memref<32x64xf32, #tpu.memory_space<vmem>>, vector<32x64xf32>,
    } else {
    }
    %c0 = arith.constant 0 : index
    %c0_1 = arith.constant 0 : index
    %3 = vector.load %arg3[%c0, %c0_1] : memref<32x48xf32, #tpu.memory_space<vmem>>, vector<32x48xf32>
    %c0_2 = arith.constant 0 : index
    %c0_3 = arith.constant 0 : index
    %4 = vector.load %arg6[%c0_2, %c0_3] : memref<32x64xf32, #tpu.memory_space<vmem>>, vector<32x64xf32>
    %5 = arith.truncf %3 : vector<32x48xf32> to vector<32x48xbf16>
    %c0_4 = arith.constant 0 : index
    %c0_5 = arith.constant 0 : index
    %6 = vector.load %arg4[%c0_4, %c0_5] : memref<48x64xbf16, #tpu.memory_space<vmem>>, vector<48x64xbf16>
    %cst = arith.constant dense<0.000000e+00> : vector<32x64xf32>
    %7 = tpu.matmul %5, %6, %cst {dimension_numbers = #tpu.dot_dimension_numbers<[1], [0], [0], [1], [0, 0, 1, 1], [], []>} : vector<32x48xbf16>, vector<48x64xbf16>, vector<32x64xf32> -> vector<32x64xf32>
    %8 = arith.addf %4, %7 : vector<32x64xf32>
    %c0_6 = arith.constant 0 : index
    %c0_7 = arith.constant 0 : index
    %9 = vector.load %arg6[%c0_6, %c0_7] : memref<32x64xf32, #tpu.memory_space<vmem>>, vector<32x64xf32>
    tpu.vector_store %arg6[%c0_6, %c0_7], %8 {strides = array<i32>} : memref<32x64xf32, #tpu.memory_space<vmem>>, vector<32x64xf32>,
    %c0_i32_8 = arith.constant 0 : i32
    %10 = arith.cmpi eq, %arg2, %c0_i32_8 : i32
    %11 = arith.extui %10 : i1 to i32
    %c0_i32_9 = arith.constant 0 : i32
    %12 = arith.cmpi ne, %11, %c0_i32_9 : i32
    scf.if %12 {
      %c0_10 = arith.constant 0 : index
      %c0_11 = arith.constant 0 : index
      %13 = vector.load %arg6[%c0_10, %c0_11] : memref<32x64xf32, #tpu.memory_space<vmem>>, vector<32x64xf32>
      %c0_12 = arith.constant 0 : index
      %c0_13 = arith.constant 0 : index
      %14 = vector.load %arg5[%c0_12, %c0_13] : memref<32x64xf32, #tpu.memory_space<vmem>>, vector<32x64xf32>
      tpu.vector_store %arg5[%c0_12, %c0_13], %13 {strides = array<i32>} : memref<32x64xf32, #tpu.memory_space<vmem>>, vector<32x64xf32>,
    } else {
    }
    return
  }
  func.func @transform_0(%arg0: i32, %arg1: i32, %arg2: i32) -> (i32, i32) {
    %c0_i32 = arith.constant 0 : i32
    return %arg0, %arg2 : i32, i32
  }
  func.func @transform_1(%arg0: i32, %arg1: i32, %arg2: i32) -> (i32, i32) {
    %c0_i32 = arith.constant 0 : i32
    return %arg2, %arg1 : i32, i32
  }
  func.func @transform_2(%arg0: i32, %arg1: i32, %arg2: i32) -> (i32, i32) {
    %c0_i32 = arith.constant 0 : i32
    return %arg0, %arg1 : i32, i32
  }
}

</mosaic_0001>

<bundles_post_ra>
// kernel: tpu_custom_call.1
= control target key start
LH: loop header
LB: loop body
LE: loop exit
PB: predicated region body
PF: predicated region fallthrough
CT: control target
= control target key end

     0   :  { %7 = vsyncpa [#allocation4], 0  ;;  %s325_s0 = inlined_call_operand.hbm [shape: f32[32,48], index: 0, kind: input, shape index: {}]   ;;  %s326_s1 = inlined_call_operand.hbm [shape: bf16[48,64], index: 1, kind: input, shape index: {}]   ;;  %s327_s2 = inlined_call_operand.hbm [shape: f32[32,64], index: 2, kind: output, shape index: {}]  }
   0x1   :  { %8 = vsyncpa [#allocation7], 0 }
   0x2   :  { %9 = vsyncpa [#allocation5], 0  ;;  %s275_s9 = smov [#allocation3]  }
   0x3   :  { %s15_s10 = sshll.u32 %s275_s9, 4  ;;  %s16_s10 = int_to_ptr.vmem [resolvable:$true] %s15_s10 }
   0x4   :  { %s217_s11 = scalar_lea.vmem %s16_s10, 512  ;;  %p222_p1 = scmp.lt.s32.totalorder %s16_s10, %s16_s10 }
   0x5   :  { %p218_p0 = scmp.ne.s32.totalorder %s16_s10, %s217_s11  ;;  %p223_p2 = scmp.lt.s32.totalorder %s217_s11, %s217_s11 }
   0x7   :  { %p224_p3 = por %p223_p2, %p222_p1 }
   0x9   :  { %p225_p4 = pnand %p224_p3, %p218_p0 }
   0xb   :  { %228 = shalt.err (!%p225_p4)
}
   0xc   :  { %s276_s12 = smov 128   ;;  %s277_s13 = smov 8  }
   0xd   :  { %21 = dma.hbm_to_vmem [thread:$0]  %s325_s0, 512, %s16_s10, [#allocation4], %s276_s12, %s276_s12, %s277_s13  }
   0xe   :  { %s278_s16 = smov [#allocation6]  }
   0xf   :  { %s27_s17 = sshll.u32 %s278_s16, 4  ;;  %s28_s17 = int_to_ptr.vmem [resolvable:$true] %s27_s17 }
  0x10   :  { %s237_s18 = scalar_lea.vmem %s28_s17, 384  ;;  %p242_p6 = scmp.lt.s32.totalorder %s28_s17, %s28_s17 }
  0x11   :  { %p238_p5 = scmp.ne.s32.totalorder %s28_s17, %s237_s18  ;;  %p243_p7 = scmp.lt.s32.totalorder %s237_s18, %s237_s18 }
  0x13   :  { %p244_p8 = por %p243_p7, %p242_p6 }
  0x15   :  { %p245_p9 = pnand %p244_p8, %p238_p5 }
  0x17   :  { %248 = shalt.err (!%p245_p9)
}
  0x18   :  { %s279_s19 = smov 64   ;;  %s280_s20 = smov 4  }
  0x19   :  { %33 = dma.hbm_to_vmem [thread:$0]  %s326_s1, 384, %s28_s17, [#allocation7], %s279_s19, %s279_s19, %s280_s20  }
  0x1a   :  { %269 = dma.done.wait [#allocation4], 512  }
  0x1b   :  { %270 = vsyncadd [#allocation4], 4294966784 }
  0x1c   :  { %271 = dma.done.wait [#allocation7], 384  }
  0x1d   :  { %272 = vsyncadd [#allocation7], 4294966912  ;;  %vm45_vm0 = vcmask 523264   ;;  %v281_v0 = vmov 0.0   ;;  %v206_v1 = vld [vmem:[#allocation6 + $0x10] sm:$0xff]   ;;  %v207_v2 = vld [vmem:[#allocation6 + $0x8] sm:$0xff]  }
  0x1e   :  { %48 = vst.msk [vmem:[#allocation2 + $0x10] sm:$0xff] %vm45_vm0, %v281_v0  ;;  %46 = vst.msk [vmem:[#allocation2] sm:$0xff] %vm45_vm0, %v281_v0  ;;  %188 = vmatprep.subr.bf16.mxu0 %v206_v1  ;;  %v50_v3 = vld [vmem:[#allocation3] sm:$0xff]  ;;  %v51_v4 = vld [vmem:[#allocation3 + $0x8] sm:$0xff]  ;;  %vm84_vm1 = vcmask 392192   ;;  %s282_s0 = smov [#allocation8]  }
  0x1f   :  { %47 = vst.msk [vmem:[#allocation2 + $0x8] sm:$0xff] %vm45_vm0, %v281_v0  ;;  %49 = vst.msk [vmem:[#allocation2 + $0x18] sm:$0xff] %vm45_vm0, %v281_v0  ;;  %189 = vmatpush3.bf16.msra.mxu0 %v206_v1  ;;  %v208_v5 = vld [vmem:[#allocation6] sm:$0xff]   ;;  %v58_v6 = vpack.c.bf16 %v51_v4, %v50_v3  ;;  %v52_v7 = vld [vmem:[#allocation3 + $0x10] sm:$0xff]  ;;  %s165_s1 = sshll.u32 %s282_s0, 4  ;;  %s166_s1 = int_to_ptr.vmem [resolvable:$true] %s165_s1 }
  0x20   :  { %190 = vmatprep.subr.bf16.mxu0 %v207_v2  ;;  %v53_v8 = vld [vmem:[#allocation3 + $0x18] sm:$0xff]  ;;  %s249_s23 = scalar_lea.vmem %s166_s1, 512  ;;  %p254_p11 = scmp.lt.s32.totalorder %s166_s1, %s166_s1 }
  0x21   :  { %194 = vmatprep.mubr.msk.bf16.mxu0 %vm84_vm1, %v58_v6  ;;  %v59_v9 = vpack.c.bf16 %v53_v8, %v52_v7  ;;  %p250_p10 = scmp.ne.s32.totalorder %s166_s1, %s249_s23  ;;  %p255_p12 = scmp.lt.s32.totalorder %s249_s23, %s249_s23 }
  0x23   :  { %191 = vmatpush3.bf16.msra.mxu0 %v207_v2  ;;  %p256_p13 = por %p255_p12, %p254_p11 }
  0x24   :  { %192 = vmatprep.subr.bf16.mxu0 %v208_v5 }
  0x25   :  { %v56_v10 = vld [vmem:[#allocation2 + $0x10] sm:$0xff]  ;;  %v54_v12 = vld [vmem:[#allocation2] sm:$0xff]  ;;  %p257_p0 = pnand %p256_p13, %p250_p10 }
  0x26   :  { %v57_v15 = vld [vmem:[#allocation2 + $0x18] sm:$0xff]  ;;  %v55_v18 = vld [vmem:[#allocation2 + $0x8] sm:$0xff] }
  0x27   :  { %193 = vmatpush3.bf16.msra.mxu0 %v208_v5 }
  0x2a   :  { %195 = vmatmul.mubr.msk.bf16.vlgmr.msra.gmra.mxu0 %vm84_vm1, %v59_v9 }
  0xea   :  { %v196_v11 = vpop.f32.mrf.mxu0 }
  0xeb   :  { %v142_v13 = vadd.f32 %v196_v11, %v56_v10 }
  0xec   :  { %v125_v14 = vpop.f32.mrf.mxu0 }
  0xed   :  { %147 = vst.msk [vmem:[#allocation2 + $0x10] sm:$0xff] %vm45_vm0, %v142_v13  ;;  %v140_v16 = vadd.f32 %v125_v14, %v54_v12 }
  0xee   :  { %v197_v17 = vpop.f32.mrf.mxu0 }
  0xef   :  { %145 = vst.msk [vmem:[#allocation2] sm:$0xff] %vm45_vm0, %v140_v16  ;;  %v143_v19 = vadd.f32 %v197_v17, %v57_v15 }
  0xf0   :  { %v128_v20 = vpop.f32.mrf.mxu0 }
  0xf1   :  { %148 = vst.msk [vmem:[#allocation2 + $0x18] sm:$0xff] %vm45_vm0, %v143_v19  ;;  %v141_v21 = vadd.f32 %v128_v20, %v55_v18 }
  0xf3   :  { %146 = vst.msk [vmem:[#allocation2 + $0x8] sm:$0xff] %vm45_vm0, %v141_v21 }
  0xf4   :  { %v154_v22 = vld [vmem:[#allocation2 + $0x10] sm:$0xff] }
  0xf5   :  { %158 = vst.msk [vmem:[#allocation8 + $0x10] sm:$0xff] %vm45_vm0, %v154_v22 }
  0xf6   :  { %v152_v23 = vld [vmem:[#allocation2] sm:$0xff] }
  0xf7   :  { %156 = vst.msk [vmem:[#allocation8] sm:$0xff] %vm45_vm0, %v152_v23 }
  0xf8   :  { %v155_v24 = vld [vmem:[#allocation2 + $0x18] sm:$0xff] }
  0xf9   :  { %159 = vst.msk [vmem:[#allocation8 + $0x18] sm:$0xff] %vm45_vm0, %v155_v24 }
  0xfa   :  { %v153_v25 = vld [vmem:[#allocation2 + $0x8] sm:$0xff] }
  0xfb   :  { %157 = vst.msk [vmem:[#allocation8 + $0x8] sm:$0xff] %vm45_vm0, %v153_v25 }
  0xfc   :  { %260 = shalt.err (!%p257_p0)
}
  0xfd   :  { %171 = dma.vmem_to_hbm [thread:$0]  %s166_s1, 512, %s327_s2, [#allocation5], %s276_s12, %s276_s12, %s277_s13  }
  0xfe   :  { %273 = dma.done.wait [#allocation5], 512  }
  0xff   :  { %274 = vsyncadd [#allocation5], 4294966784 }
 0x100   :  { %175 = vsyncpa [#allocation4], 1 }
 0x101   :  { %176 = vsyncpa [#allocation7], 1 }
 0x102   :  { %177 = vsyncpa [#allocation5], 1 }

</bundles_post_ra>
